<compile_context>
chip_gen: v5e
topology: v5e:2x2
jax: 0.10.0
libtpu: 0.0.40
codegen_flags: <defaults>
</compile_context>

<pallas_src>
import functools

import jax
import jax.numpy as jnp
import numpy as np
from jax.experimental import pallas as pl
from jax.experimental.pallas import tpu as pltpu


_MAX_TILE_INPUT_BYTES = 4 * 1024 * 1024  # ~2-4 MiB DMA tiles already saturate HBM BW


def _rmsnorm_kernel(x_ref, w_ref, o_ref, *, eps):
    # x_ref: (tile_rows, H)   w_ref: (1, H) f32   o_ref: (tile_rows, H)
    x = x_ref[...]
    x_f32 = x.astype(jnp.float32)
    var = jnp.mean(x_f32 * x_f32, axis=-1, keepdims=True)
    normed = x_f32 * jax.lax.rsqrt(var + eps)          # rsqrt -> EUP (free slot)
    # torch: weight * self._norm(x.float()).type_as(x)  -> round-trip via x.dtype
    normed = normed.astype(x.dtype).astype(jnp.float32)
    o_ref[...] = (w_ref[...] * normed).astype(o_ref.dtype)


def _sublane_packing(dtype) -> int:
    # native sublane tile: 8 rows for 4-byte, 16 for 2-byte, 32 for 1-byte dtypes
    return 8 * max(1, 4 // np.dtype(dtype).itemsize)


def _round_up(x: int, m: int) -> int:
    return ((x + m - 1) // m) * m


def _vmem_limit_bytes() -> int:
    # min(physical/2, 32 MiB): 32 MiB on v5e/v6e (128 MiB phys) and v7x (64 MiB).
    # Explicit bump over the 16 MiB default scoped limit on v5e; == default on v6e.
    try:
        cap = int(pltpu.get_tpu_info().vmem_capacity_bytes)
    except Exception:
        cap = 64 * 1024 * 1024
    return int(min(max(cap // 2, 16 * 1024 * 1024), 32 * 1024 * 1024))


def _num_tensorcores() -> int:
    # Best-effort query; only used to decide whether to force >= 2 grid steps
    # (needed on 2-TC v7x, pure overhead on 1-TC v5e/v6e).
    try:
        info = pltpu.get_tpu_info()
        for attr in ("num_cores", "num_tensorcores", "tensorcore_count",
                     "cores_per_chip"):
            v = getattr(info, attr, None)
            if isinstance(v, int) and v > 0:
                return v
    except Exception:
        pass
    return 1


def _pick_tile_rows(R, H, in_bytes, out_bytes, packing, vmem_limit, num_cores) -> int:
    # Full per-row VMEM footprint: double-buffered input + output tiles PLUS the
    # in-kernel f32 temporaries (x_f32, squared, normed) which each materialize a
    # (tile_rows, H) f32 array.
    per_row = 2 * H * (in_bytes + out_bytes) + 3 * 4 * H
    usable = vmem_limit // 2                 # ~50% utilization: slack for compiler scratch
    tile = usable // per_row
    # Cap the DMA tile at a few MiB of input — beyond that bandwidth gain is ~1%
    # but VMEM pressure doubles.
    tile = min(tile, _MAX_TILE_INPUT_BYTES // max(1, H * in_bytes))
    tile = max(packing, (tile // packing) * packing)
    # Never larger than the (sublane-rounded) total row count.
    tile = min(tile, _round_up(R, packing))
    # Only on multi-TensorCore chips (v7x): ensure >= num_cores roughly balanced
    # grid steps so every core's DMA/load-store path is driven.
    if num_cores >= 2 and R > packing and pl.cdiv(R, tile) < num_cores:
        tile = max(packing, _round_up(pl.cdiv(R, num_cores), packing))
    return tile


def rmsnorm(hidden_states: jax.Array, weight: jax.Array, eps: float = 1e-6,
            tile_rows: int | None = None, out_dtype=None) -> jax.Array:
    """RMSNorm over the last axis. hidden_states: (..., H), weight: (H,).

    out_dtype defaults to hidden_states.dtype (halves writeback for bf16 inputs).
    Pass out_dtype=jnp.promote_types(weight.dtype, hidden_states.dtype) for strict
    torch output-dtype parity (numerics are identical either way).
    """
    orig_shape = hidden_states.shape
    H = orig_shape[-1]
    x2d = hidden_states.reshape(-1, H)
    R = x2d.shape[0]

    if out_dtype is None:
        out_dtype = hidden_states.dtype

    # Hoist the weight f32 upcast out of the kernel body; block is VMEM-resident.
    w2d = weight.astype(jnp.float32).reshape(1, H)

    in_bytes = np.dtype(hidden_states.dtype).itemsize
    out_bytes = np.dtype(out_dtype).itemsize
    packing = _sublane_packing(hidden_states.dtype)
    vmem_limit = _vmem_limit_bytes()
    if tile_rows is None:
        tile_rows = _pick_tile_rows(R, H, in_bytes, out_bytes, packing,
                                    vmem_limit, _num_tensorcores())

    # Ragged last block is handled by Pallas: rows are independent, garbage rows
    # in the padded tail never contaminate valid rows, and OOB writes are dropped.
    grid = (pl.cdiv(R, tile_rows),)

    out = pl.pallas_call(
        functools.partial(_rmsnorm_kernel, eps=eps),
        out_shape=jax.ShapeDtypeStruct((R, H), out_dtype),
        grid_spec=pltpu.PrefetchScalarGridSpec(
            num_scalar_prefetch=0,
            grid=grid,
            in_specs=[
                pl.BlockSpec((tile_rows, H), lambda i: (i, 0)),
                pl.BlockSpec((1, H), lambda i: (0, 0)),
            ],
            out_specs=pl.BlockSpec((tile_rows, H), lambda i: (i, 0)),
        ),
        compiler_params=pltpu.CompilerParams(
            # Rows are independent; "parallel" lets the runtime shard grid steps
            # across v7x's two TensorCores.
            dimension_semantics=("parallel",),
            vmem_limit_bytes=vmem_limit,
        ),
    )(x2d, w2d)

    return out.reshape(orig_shape[:-1] + (H,))


def rmsnorm_reference(x, w, eps=1e-6, out_dtype=None):
    # torch math: normalize in f32, cast back to x.dtype, multiply by f32 weight.
    xf = x.astype(jnp.float32)
    var = jnp.mean(xf * xf, axis=-1, keepdims=True)
    normed = (xf * jax.lax.rsqrt(var + eps)).astype(x.dtype)
    out = w.astype(jnp.float32) * normed.astype(jnp.float32)
    return out.astype(x.dtype if out_dtype is None else out_dtype)


if __name__ == "__main__":
    key = jax.random.PRNGKey(0)
    k_x, k_w, k_b = jax.random.split(key, 3)

    # f32 test (shapes consistent with the module: batch=2, seq=8, hidden=32)
    batch, seq, hidden = 2, 8, 32
    x = jax.random.normal(k_x, (batch, seq, hidden), dtype=jnp.float32)
    # weight is nn.Parameter(torch.ones(H)) at init; use non-trivial values to
    # actually exercise the scale multiply.
    weight = 1.0 + 0.1 * jax.random.normal(k_w, (hidden,), dtype=jnp.float32)

    out = jax.block_until_ready(rmsnorm(x, weight, eps=1e-6))
    ref = rmsnorm_reference(x, weight, eps=1e-6)
    assert out.shape == ref.shape and out.dtype == jnp.float32
    assert jnp.allclose(out, ref, atol=1e-5, rtol=1e-5), "f32 mismatch vs reference"

    # bf16 + ragged-row test (no-pad cdiv path; perf default keeps bf16 output)
    xb = jax.random.normal(k_b, (3, 5, hidden), dtype=jnp.bfloat16)
    outb = jax.block_until_ready(rmsnorm(xb, weight, eps=1e-6))
    refb = rmsnorm_reference(xb, weight, eps=1e-6)
    assert outb.shape == refb.shape and outb.dtype == jnp.bfloat16
    assert jnp.allclose(outb.astype(jnp.float32), refb.astype(jnp.float32),
                        atol=2e-2, rtol=2e-2), "bf16 mismatch vs reference"

    # strict torch-promotion opt-in (f32 weight * bf16 normed -> f32 output)
    out_promoted = jax.block_until_ready(
        rmsnorm(xb, weight, eps=1e-6,
                out_dtype=jnp.promote_types(weight.dtype, xb.dtype)))
    ref_promoted = rmsnorm_reference(xb, weight, eps=1e-6, out_dtype=jnp.float32)
    assert out_promoted.dtype == jnp.float32
    assert jnp.allclose(out_promoted, ref_promoted, atol=2e-2, rtol=2e-2), \
        "promoted-output mismatch vs reference"

    print("KERNEL_OK")
</pallas_src>

<mosaic_0001>
module attributes {stable_mosaic.version = 11 : i64} {
  func.func @_rmsnorm_kernel(%arg0: i32, %arg1: memref<16x32xf32, #tpu.memory_space<vmem>>, %arg2: memref<1x32xf32, #tpu.memory_space<vmem>>, %arg3: memref<16x32xf32, #tpu.memory_space<vmem>>) attributes {dimension_semantics = [#tpu.dimension_semantics<parallel>], iteration_bounds = array<i64: 1>, scalar_prefetch = 0 : i64, scratch_operands = 0 : i64, tpu.core_type = #tpu.core_type<tc>, window_params = [{transform_indices = @transform_0, window_bounds = array<i64: 16, 32>}, {pipeline_mode = #tpu.pipeline_mode<synchronous>, transform_indices = @transform_1, window_bounds = array<i64: 1, 32>}, {transform_indices = @transform_2, window_bounds = array<i64: 16, 32>}]} {
    %c0 = arith.constant 0 : index
    %c0_0 = arith.constant 0 : index
    %0 = vector.load %arg1[%c0, %c0_0] : memref<16x32xf32, #tpu.memory_space<vmem>>, vector<16x32xf32>
    %1 = arith.mulf %0, %0 : vector<16x32xf32>
    %cst = arith.constant dense<0.000000e+00> : vector<16xf32>
    %2 = vector.multi_reduction <add>, %1, %cst [1] : vector<16x32xf32> to vector<16xf32>
    %3 = vector.shape_cast %2 : vector<16xf32> to vector<16x1xf32>
    %cst_1 = arith.constant 3.200000e+01 : f32
    %4 = vector.broadcast %cst_1 : f32 to vector<16x1xf32>
    %5 = arith.divf %3, %4 : vector<16x1xf32>
    %cst_2 = arith.constant 9.99999997E-7 : f32
    %6 = vector.broadcast %cst_2 : f32 to vector<16x1xf32>
    %7 = arith.addf %5, %6 : vector<16x1xf32>
    %8 = math.rsqrt %7 : vector<16x1xf32>
    %9 = vector.broadcast %8 : vector<16x1xf32> to vector<16x32xf32>
    %10 = arith.mulf %0, %9 : vector<16x32xf32>
    %c0_3 = arith.constant 0 : index
    %c0_4 = arith.constant 0 : index
    %11 = vector.load %arg2[%c0_3, %c0_4] : memref<1x32xf32, #tpu.memory_space<vmem>>, vector<1x32xf32>
    %12 = vector.broadcast %11 : vector<1x32xf32> to vector<16x32xf32>
    %13 = arith.mulf %12, %10 : vector<16x32xf32>
    %c0_5 = arith.constant 0 : index
    %c0_6 = arith.constant 0 : index
    %14 = vector.load %arg3[%c0_5, %c0_6] : memref<16x32xf32, #tpu.memory_space<vmem>>, vector<16x32xf32>
    tpu.vector_store %arg3[%c0_5, %c0_6], %13 {strides = array<i32>} : memref<16x32xf32, #tpu.memory_space<vmem>>, vector<16x32xf32>,
    return
  }
  func.func @transform_0(%arg0: i32) -> (i32, i32) {
    %c0_i32 = arith.constant 0 : i32
    %c0_i32_0 = arith.constant 0 : i32
    return %arg0, %c0_i32 : i32, i32
  }
  func.func @transform_1(%arg0: i32) -> (i32, i32) {
    %c0_i32 = arith.constant 0 : i32
    %c0_i32_0 = arith.constant 0 : i32
    %c0_i32_1 = arith.constant 0 : i32
    return %c0_i32, %c0_i32_0 : i32, i32
  }
  func.func @transform_2(%arg0: i32) -> (i32, i32) {
    %c0_i32 = arith.constant 0 : i32
    %c0_i32_0 = arith.constant 0 : i32
    return %arg0, %c0_i32 : i32, i32
  }
}

</mosaic_0001>

<bundles_post_ra>
// kernel: tpu_custom_call.1
= control target key start
LH: loop header
LB: loop body
LE: loop exit
PB: predicated region body
PF: predicated region fallthrough
CT: control target
= control target key end

     0   :  { %7 = vsyncpa [#allocation3], 0  ;;  %s245_s0 = inlined_call_operand.hbm [shape: f32[16,32], index: 0, kind: input, shape index: {}]   ;;  %s246_s1 = inlined_call_operand.hbm [shape: f32[1,32], index: 1, kind: input, shape index: {}]   ;;  %s247_s2 = inlined_call_operand.hbm [shape: f32[16,32], index: 2, kind: output, shape index: {}]  }
   0x1   :  { %8 = vsyncpa [#allocation6], 0 }
   0x2   :  { %9 = vsyncpa [#allocation4], 0  ;;  %s14_s11 = sshll.u32 %s245_s0, 4  ;;  %s205_s12 = smov [#allocation2]   ;;  %s15_s11 = int_to_ptr.hbm [resolvable:$true] %s14_s11 }
   0x3   :  { %s16_s13 = sshll.u32 %s205_s12, 4  ;;  %s28_s16 = sshll.u32 %s246_s1, 4  ;;  %s17_s13 = int_to_ptr.vmem [resolvable:$true] %s16_s13  ;;  %s29_s16 = int_to_ptr.hbm [resolvable:$true] %s28_s16 }
   0x4   :  { %s206_s17 = smov 128   ;;  %s207_s18 = smov 8  }
   0x5   :  { %22 = dma.hbm_to_vmem [thread:$0]  %s15_s11, 256, %s17_s13, [#allocation3], %s206_s17, %s206_s17, %s207_s18  }
   0x6   :  { %s208_s19 = smov [#allocation5]  }
   0x7   :  { %s30_s20 = sshll.u32 %s208_s19, 4  ;;  %s31_s20 = int_to_ptr.vmem [resolvable:$true] %s30_s20 }
   0x8   :  { %33 = dma.hbm_to_vmem [thread:$0]  %s29_s16, 16, %s31_s20, [#allocation6]  }
   0x9   :  { %199 = dma.done.wait [#allocation3], 256  }
   0xa   :  { %200 = vsyncadd [#allocation3], 4294967040 }
   0xb   :  { %201 = dma.done.wait [#allocation6], 16  }
   0xc   :  { %202 = vsyncadd [#allocation6], 4294967280  ;;  %v42_v0 = vld [vmem:[#allocation2] sm:$0xff]  ;;  %vm46_vm0 = vcmask 261120   ;;  %v43_v2 = vld [vmem:[#allocation2 + $0x8] sm:$0xff]  ;;  %v209_v6 = vmov 32.0  }
   0xd   :  { %v44_v1 = vmul.f32 %v42_v0, %v42_v0  ;;  %v45_v4 = vmul.f32 %v43_v2, %v43_v2  ;;  %121 = vrcp.f32 %v209_v6  ;;  %v120_v27 = vld [vmem:[#allocation5] ss:$0 sm:$0xff]  ;;  %s210_s0 = smov [#allocation7]   ;;  %s100_s23 = sshll.u32 %s247_s2, 4  ;;  %s101_s23 = int_to_ptr.hbm [resolvable:$true] %s100_s23 }
   0xe   :  { %s98_s1 = sshll.u32 %s210_s0, 4  ;;  %s99_s1 = int_to_ptr.vmem [resolvable:$true] %s98_s1 }
   0xf   :  { %v47_v3 = vsel %vm46_vm0, %v44_v1, 0.0  ;;  %v50_v5 = vsel %vm46_vm0, %v45_v4, 0.0 }
  0x10   :  { %48 = vadd.xlane.f32.xlu0 %v47_v3 }
  0x13   :  { %v122_v7 = vpop.eup %121 }
  0x14   :  { %v54_v8 = vmul.f32 32.0, %v122_v7  ;;  %vm58_vm1 = vweird.f32 %v122_v7 }
  0x16   :  { %v55_v9 = vsub.f32 1.0, %v54_v8 }
  0x18   :  { %51 = vadd.xlane.f32.xlu0 %v50_v5  ;;  %v56_v10 = vmul.f32 %v122_v7, %v55_v9 }
  0x1a   :  { %v57_v11 = vadd.f32 %v122_v7, %v56_v10 }
  0x1c   :  { %v59_v12 = vsel %vm58_vm1, %v122_v7, %v57_v11 }
  0x83   :  { %v49_v13 = vpop.xlane.xlu0 %48 }
  0x84   :  { %v60_v14 = vmul.f32 %v59_v12, %v49_v13 }
  0x86   :  { %v62_v15 = vadd.f32 1e-06, %v60_v14 }
  0x88   :  { %123 = vrsqrt.f32 %v62_v15  ;;  %vm70_vm3 = vweird.f32 %v62_v15 }
  0x8b   :  { %v52_v16 = vpop.xlane.xlu0 %51 }
  0x8c   :  { %v61_v17 = vmul.f32 %v59_v12, %v52_v16 }
  0x8e   :  { %v124_v18 = vpop.eup %123  ;;  %v63_v19 = vadd.f32 1e-06, %v61_v17 }
  0x8f   :  { %v65_v20 = vmul.f32 %v124_v18, %v62_v15  ;;  %vm71_vm2 = vweird.f32 %v124_v18 }
  0x90   :  { %125 = vrsqrt.f32 %v63_v19  ;;  %vm72_vm4 = vmor %vm70_vm3, %vm71_vm2  ;;  %vm80_vm6 = vweird.f32 %v63_v19 }
  0x91   :  { %v66_v21 = vmul.f32 %v124_v18, %v65_v20 }
  0x93   :  { %v67_v22 = vmul.f32 0.5, %v66_v21 }
  0x95   :  { %v68_v23 = vsub.f32 1.5, %v67_v22 }
  0x96   :  { %v126_v24 = vpop.eup %125 }
  0x97   :  { %v69_v25 = vmul.f32 %v124_v18, %v68_v23  ;;  %v75_v26 = vmul.f32 %v126_v24, %v63_v19  ;;  %vm81_vm5 = vweird.f32 %v126_v24 }
  0x98   :  { %vm82_vm7 = vmor %vm80_vm6, %vm81_vm5 }
  0x99   :  { %v73_v28 = vsel %vm72_vm4, %v124_v18, %v69_v25  ;;  %v76_v29 = vmul.f32 %v126_v24, %v75_v26 }
  0x9a   :  { %v84_v30 = vmul.f32 %v73_v28, %v42_v0 }
  0x9b   :  { %v77_v31 = vmul.f32 0.5, %v76_v29 }
  0x9c   :  { %v90_v32 = vmul.f32 %v120_v27, %v84_v30 }
  0x9d   :  { %v78_v33 = vsub.f32 1.5, %v77_v31 }
  0x9e   :  { %92 = vst.msk [vmem:[#allocation7] sm:$0xff] %vm46_vm0, %v90_v32 }
  0x9f   :  { %v79_v34 = vmul.f32 %v126_v24, %v78_v33 }
  0xa1   :  { %v83_v35 = vsel %vm82_vm7, %v126_v24, %v79_v34 }
  0xa2   :  { %v85_v36 = vmul.f32 %v83_v35, %v43_v2 }
  0xa4   :  { %v91_v37 = vmul.f32 %v120_v27, %v85_v36 }
  0xa6   :  { %93 = vst.msk [vmem:[#allocation7 + $0x8] sm:$0xff] %vm46_vm0, %v91_v37 }
  0xa7   :  { %106 = dma.vmem_to_hbm [thread:$0]  %s99_s1, 256, %s101_s23, [#allocation4], %s206_s17, %s206_s17, %s207_s18  }
  0xa8   :  { %203 = dma.done.wait [#allocation4], 256  }
  0xa9   :  { %204 = vsyncadd [#allocation4], 4294967040 }
  0xaa   :  { %111 = vsyncpa [#allocation3], 1 }
  0xab   :  { %112 = vsyncpa [#allocation6], 1 }
  0xac   :  { %113 = vsyncpa [#allocation4], 1 }

</bundles_post_ra>
